<compile_context>
chip_gen: v6e
topology: v6e:2x2x1
jax: 0.10.0
libtpu: 0.0.40
codegen_flags: <defaults>
</compile_context>

<pallas_src>
import functools

import jax
import jax.numpy as jnp
from jax.experimental import pallas as pl
from jax.experimental.pallas import tpu as pltpu

# small synthetic shapes consistent with the module's forward
B = 2      # batch
S = 8      # sequence length
V = 16     # vocab size
E = 32     # embedding dim
L = 8      # latent size
C = 2      # number of style classes (one-hot c)
H = 32     # decoder hidden dim
BS = B * S

assert S & (S - 1) == 0, "batch-major selector uses r >> log2(S); S must be a power of 2"
LOG2_S = S.bit_length() - 1

F32 = jnp.float32

# ---- per-call packed input slab layout (one DMA for all small operands) ----
SLAB_LANES = 128
ROW_IDS = 0              # rows 0..BS-1, lane 0 : token ids (as f32), batch-major
ROW_BML = BS             # row 16, lanes 0..2L-1 : bias of fused mean|logv proj
ROW_BH = BS + 1          # row 17, lanes 0..H-1  : decoder hidden bias
ROW_BOUT = BS + 2        # row 18, lanes 0..V-1  : output bias
ROW_EPS = BS + 3         # rows 19..20, lanes 0..L-1 : eps ~ N(0, I)
ROW_C = BS + 3 + B       # rows 21..22, lanes 0..C-1 : one-hot style code c
SLAB_ROWS = 24           # padded to a multiple of 8 sublanes

# ---- merged output slab layout (one writeback DMA) ----
OUT_LANES = 128
ENC_OFF = 64             # rows 0..B-1, lanes 64..: mean | logv | z | c
# lanes 0..V-1 of every row r = b*S + s hold logp[b, s, :]


# ----------------------------------------------------------------------------
# Fused kernel: embed -> encoder (mean-pool + fused mean|logv linear) ->
#               reparameterize -> decoder (accumulating matmuls) -> log_softmax
# Row layout of all (BS, feature) activations: row r = b*S + s  (batch-major)
# ----------------------------------------------------------------------------
def _wsvae_fused_kernel(slab_ref, table_ref, wml_ref, we2h_ref, wz2h_ref,
                        wout_ref, out_ref):
    # ---- unpack the single packed per-call slab (row indexing only) ----
    ids = slab_ref[0:BS, 0:1].astype(jnp.int32)                     # (BS, 1)
    b_ml = slab_ref[ROW_BML:ROW_BML + 1, 0:2 * L]                   # (1, 2L)
    b_h = slab_ref[ROW_BH:ROW_BH + 1, 0:H]                          # (1, H)
    b_out = slab_ref[ROW_BOUT:ROW_BOUT + 1, 0:V]                    # (1, V)
    eps = slab_ref[ROW_EPS:ROW_EPS + B, 0:L]                        # (B, L)
    c = slab_ref[ROW_C:ROW_C + B, 0:C]                              # (B, C)

    # ---- in-kernel embedding gather: one-hot (iota compare) @ table on MXU ----
    # NOTE: out-of-range ids map to an all-zero embedding row (nn.Embedding
    # would raise); ids are generated in [0, V) here.
    vocab_iota = jax.lax.broadcasted_iota(jnp.int32, (BS, V), 1)
    onehot = (ids == vocab_iota).astype(F32)                        # (BS, V)
    emb = jnp.dot(onehot, table_ref[...],
                  preferred_element_type=F32)                       # (BS, E)

    # ---- batch selectors (batch-major rows: batch(r) = r >> log2(S)) ----
    row_b = jnp.right_shift(
        jax.lax.broadcasted_iota(jnp.int32, (BS, B), 0), LOG2_S)
    col_b = jax.lax.broadcasted_iota(jnp.int32, (BS, B), 1)
    sel = (row_b == col_b).astype(F32)                              # (BS, B)
    lane_b = jnp.right_shift(
        jax.lax.broadcasted_iota(jnp.int32, (B, BS), 1), LOG2_S)
    sub_b = jax.lax.broadcasted_iota(jnp.int32, (B, BS), 0)
    selT = (lane_b == sub_b).astype(F32)                            # (B, BS)

    # ---- encoder: mean pool over S, fused mean|logv projection ----
    pooled = jnp.dot(selT, emb, preferred_element_type=F32) * (1.0 / S)   # (B, E)
    stats = jnp.dot(pooled, wml_ref[...],
                    preferred_element_type=F32) + b_ml                    # (B, 2L)
    mean = stats[:, 0:L]
    logv = stats[:, L:2 * L]

    # ---- reparameterization: z = eps * exp(0.5*logv) + mean (no concat) ----
    std = jnp.exp(0.5 * logv)
    z = eps * std + mean                                            # (B, L)

    # ---- decoder: accumulating matmuls, no value concatenation ----
    hz = (jnp.dot(z, wz2h_ref[0:L, :], preferred_element_type=F32)
          + jnp.dot(c, wz2h_ref[L:L + C, :], preferred_element_type=F32))  # (B, H)
    feat = jnp.tanh(jnp.dot(emb, we2h_ref[...], preferred_element_type=F32)
                    + jnp.dot(sel, hz, preferred_element_type=F32)
                    + b_h)                                          # (BS, H)
    logits = jnp.dot(feat, wout_ref[...],
                     preferred_element_type=F32) + b_out            # (BS, V)

    # ---- numerically stable log_softmax over vocab (lane axis) ----
    m = jnp.max(logits, axis=-1, keepdims=True)
    lse = jnp.log(jnp.sum(jnp.exp(logits - m), axis=-1, keepdims=True)) + m
    logp = logits - lse                                             # (BS, V)

    # ---- single merged output slab (one writeback DMA) ----
    out_ref[...] = jnp.zeros((BS, OUT_LANES), F32)
    out_ref[:, 0:V] = logp                                          # rows = (b, s)
    out_ref[0:B, ENC_OFF:ENC_OFF + 2 * L] = stats                   # mean | logv
    out_ref[0:B, ENC_OFF + 2 * L:ENC_OFF + 3 * L] = z               # z
    out_ref[0:B, ENC_OFF + 3 * L:ENC_OFF + 3 * L + C] = c           # c  (z|c = z_cat)


def _vmem_spec():
    return pl.BlockSpec(memory_space=pltpu.MemorySpace.VMEM)


def wsvae_fused(slab, emb_table, w_ml, w_e2h, w_z2h, w_out):
    return pl.pallas_call(
        _wsvae_fused_kernel,
        in_specs=[_vmem_spec() for _ in range(6)],
        out_specs=_vmem_spec(),
        out_shape=jax.ShapeDtypeStruct((BS, OUT_LANES), F32),
    )(slab, emb_table, w_ml, w_e2h, w_z2h, w_out)


# ----------------------------------------------------------------------------
# Parameter init (deterministic, synthetic).  Biases are pre-packed once into
# the base input slab; decoder weights stay un-concatenated.
# ----------------------------------------------------------------------------
def init_params(key):
    ks = jax.random.split(key, 12)
    sc = 0.02
    emb_table = sc * jax.random.normal(ks[0], (V, E), F32)
    w_mean = sc * jax.random.normal(ks[1], (E, L), F32)
    w_logv = sc * jax.random.normal(ks[2], (E, L), F32)
    w_z2h = sc * jax.random.normal(ks[3], (L + C, H), F32)
    w_e2h = sc * jax.random.normal(ks[4], (E, H), F32)
    w_out = sc * jax.random.normal(ks[5], (H, V), F32)
    b_ml = sc * jax.random.normal(ks[6], (2 * L,), F32)
    b_h = sc * jax.random.normal(ks[7], (H,), F32)
    b_out = sc * jax.random.normal(ks[8], (V,), F32)

    slab_base = jnp.zeros((SLAB_ROWS, SLAB_LANES), F32)
    slab_base = slab_base.at[ROW_BML, 0:2 * L].set(b_ml)
    slab_base = slab_base.at[ROW_BH, 0:H].set(b_h)
    slab_base = slab_base.at[ROW_BOUT, 0:V].set(b_out)

    return {
        "emb_table": emb_table,
        "w_ml": jnp.concatenate([w_mean, w_logv], axis=1),   # (E, 2L) fused proj
        "w_e2h": w_e2h,                                      # (E, H)
        "w_z2h": w_z2h,                                      # (L+C, H)
        "w_out": w_out,                                      # (H, V)
        "slab_base": slab_base,                              # biases pre-packed
        # plain bias copies kept only for the pure-JAX reference
        "b_ml": b_ml, "b_h": b_h, "b_out": b_out,
        # discriminator weights (used only in the non-pretraining branch)
        "w_disc": sc * jax.random.normal(ks[9], (E, C), F32),
        "b_disc": jnp.zeros((1, C), F32),
    }


def sample_noise(key):
    """c = multinomial([0.5, 0.5], B) one-hot, eps ~ N(0, I)."""
    k_c, k_eps = jax.random.split(key)
    c_idx = jax.random.bernoulli(k_c, 0.5, (B,)).astype(jnp.int32)
    c = jax.nn.one_hot(c_idx, C, dtype=F32)              # (B, C)
    eps = jax.random.normal(k_eps, (B, L), dtype=F32)    # (B, L)
    return eps, c


@functools.partial(jax.jit, static_argnames=("pretraining",))
def wsvae_forward(params, input_sequence, key, pretraining=True):
    """Mirrors WSVAE_model.forward (pretraining branch).

    Returns (logp, mean, logv, z):
      logp (B, S, V), mean/logv (1, B, L), z (1, B, L+C) where z = cat(z, c).
    """
    if not pretraining:
        # TODO(synk): non-pretraining branch (discriminator logits + hard
        # gumbel_softmax straight-through) not implemented in this synthetic kernel.
        raise NotImplementedError

    eps, c = sample_noise(key)

    # assemble the single per-call input slab (ids batch-major: row = b*S + s)
    ids_bm = input_sequence.reshape(BS).astype(F32)
    slab = params["slab_base"]
    slab = slab.at[0:BS, 0].set(ids_bm)
    slab = slab.at[ROW_EPS:ROW_EPS + B, 0:L].set(eps)
    slab = slab.at[ROW_C:ROW_C + B, 0:C].set(c)

    out = wsvae_fused(slab, params["emb_table"], params["w_ml"],
                      params["w_e2h"], params["w_z2h"], params["w_out"])

    logp = out[:, 0:V].reshape(B, S, V)                       # free (view) reshape
    mean = out[0:B, ENC_OFF:ENC_OFF + L][None]                # (1, B, L)
    logv = out[0:B, ENC_OFF + L:ENC_OFF + 2 * L][None]        # (1, B, L)
    z = out[0:B, ENC_OFF + 2 * L:ENC_OFF + 3 * L + C][None]   # (1, B, L+C) = z|c
    return logp, mean, logv, z


# ----------------------------------------------------------------------------
# Pure-JAX reference of the same synthetic architecture (for validation)
# ----------------------------------------------------------------------------
def wsvae_forward_ref(params, input_sequence, eps, c):
    emb = params["emb_table"][input_sequence]            # (B, S, E)
    pooled = emb.mean(axis=1)                            # (B, E)
    stats = pooled @ params["w_ml"] + params["b_ml"]
    mean, logv = stats[:, :L], stats[:, L:2 * L]
    std = jnp.exp(0.5 * logv)
    z = eps * std + mean
    z_cat = jnp.concatenate([z, c], axis=1)              # (B, L+C)
    w_dec = jnp.concatenate([params["w_e2h"], params["w_z2h"]], axis=0)
    x = jnp.concatenate(
        [emb, jnp.broadcast_to(z_cat[:, None, :], (B, S, L + C))], axis=-1)
    feat = jnp.tanh(x @ w_dec + params["b_h"])
    logits = feat @ params["w_out"] + params["b_out"]
    logp = jax.nn.log_softmax(logits, axis=-1)
    return logp, mean[None], logv[None], z_cat[None]


if __name__ == "__main__":
    root = jax.random.PRNGKey(0)
    k_param, k_data, k_sample = jax.random.split(root, 3)

    params = init_params(k_param)
    input_sequence = jax.random.randint(k_data, (B, S), 0, V, dtype=jnp.int32)

    logp, mean, logv, z = wsvae_forward(params, input_sequence, k_sample,
                                        pretraining=True)
    jax.block_until_ready((logp, mean, logv, z))

    assert logp.shape == (B, S, V)
    assert mean.shape == (1, B, L) and logv.shape == (1, B, L)
    assert z.shape == (1, B, L + C)

    # sanity: rows of logp are valid log-probabilities
    assert jnp.allclose(jnp.exp(logp).sum(-1), 1.0, atol=1e-4)

    # validate against a pure-JAX reference (same eps / c stream)
    eps_chk, c_chk = sample_noise(k_sample)
    logp_r, mean_r, logv_r, z_r = wsvae_forward_ref(params, input_sequence,
                                                    eps_chk, c_chk)
    assert jnp.allclose(logp, logp_r, rtol=1e-3, atol=1e-4)
    assert jnp.allclose(mean, mean_r, rtol=1e-3, atol=1e-5)
    assert jnp.allclose(logv, logv_r, rtol=1e-3, atol=1e-5)
    assert jnp.allclose(z, z_r, rtol=1e-3, atol=1e-5)

    print("KERNEL_OK")
</pallas_src>

<mosaic_0001>
module attributes {stable_mosaic.version = 11 : i64} {
  func.func @_wsvae_fused_kernel(%arg0: memref<24x128xf32, #tpu.memory_space<vmem>>, %arg1: memref<16x32xf32, #tpu.memory_space<vmem>>, %arg2: memref<32x16xf32, #tpu.memory_space<vmem>>, %arg3: memref<32x32xf32, #tpu.memory_space<vmem>>, %arg4: memref<10x32xf32, #tpu.memory_space<vmem>>, %arg5: memref<32x16xf32, #tpu.memory_space<vmem>>, %arg6: memref<16x128xf32, #tpu.memory_space<vmem>>) attributes {dimension_semantics = [], scalar_prefetch = 0 : i64, scratch_operands = 0 : i64, tpu.core_type = #tpu.core_type<tc>} {
    %c0 = arith.constant 0 : index
    %c0_0 = arith.constant 0 : index
    %0 = vector.load %arg0[%c0, %c0_0] : memref<24x128xf32, #tpu.memory_space<vmem>>, vector<16x1xf32>
    %1 = arith.fptosi %0 : vector<16x1xf32> to vector<16x1xi32>
    %c16 = arith.constant 16 : index
    %c0_1 = arith.constant 0 : index
    %2 = vector.load %arg0[%c16, %c0_1] : memref<24x128xf32, #tpu.memory_space<vmem>>, vector<1x16xf32>
    %c17 = arith.constant 17 : index
    %c0_2 = arith.constant 0 : index
    %3 = vector.load %arg0[%c17, %c0_2] : memref<24x128xf32, #tpu.memory_space<vmem>>, vector<1x32xf32>
    %c18 = arith.constant 18 : index
    %c0_3 = arith.constant 0 : index
    %4 = vector.load %arg0[%c18, %c0_3] : memref<24x128xf32, #tpu.memory_space<vmem>>, vector<1x16xf32>
    %c19 = arith.constant 19 : index
    %c0_4 = arith.constant 0 : index
    %5 = vector.load %arg0[%c19, %c0_4] : memref<24x128xf32, #tpu.memory_space<vmem>>, vector<2x8xf32>
    %c21 = arith.constant 21 : index
    %c0_5 = arith.constant 0 : index
    %6 = vector.load %arg0[%c21, %c0_5] : memref<24x128xf32, #tpu.memory_space<vmem>>, vector<2x2xf32>
    %7 = tpu.iota {dimensions = array<i32: 1>} : vector<16x16xi32>
    %8 = vector.broadcast %1 : vector<16x1xi32> to vector<16x16xi32>
    %9 = arith.cmpi eq, %8, %7 : vector<16x16xi32>
    %10 = arith.extui %9 : vector<16x16xi1> to vector<16x16xi32>
    %11 = arith.sitofp %10 : vector<16x16xi32> to vector<16x16xf32>
    %c0_6 = arith.constant 0 : index
    %c0_7 = arith.constant 0 : index
    %12 = vector.load %arg1[%c0_6, %c0_7] : memref<16x32xf32, #tpu.memory_space<vmem>>, vector<16x32xf32>
    %cst = arith.constant dense<0.000000e+00> : vector<16x32xf32>
    %13 = tpu.matmul %11, %12, %cst {dimension_numbers = #tpu.dot_dimension_numbers<[1], [0], [0], [1], [0, 0, 1, 1], [], []>} : vector<16x16xf32>, vector<16x32xf32>, vector<16x32xf32> -> vector<16x32xf32>
    %14 = tpu.iota {dimensions = array<i32: 0>} : vector<16x2xi32>
    %c3_i32 = arith.constant 3 : i32
    %15 = vector.broadcast %c3_i32 : i32 to vector<16x2xi32>
    %16 = arith.shrsi %14, %15 : vector<16x2xi32>
    %17 = tpu.iota {dimensions = array<i32: 1>} : vector<16x2xi32>
    %18 = arith.cmpi eq, %16, %17 : vector<16x2xi32>
    %19 = arith.extui %18 : vector<16x2xi1> to vector<16x2xi32>
    %20 = arith.sitofp %19 : vector<16x2xi32> to vector<16x2xf32>
    %21 = tpu.iota {dimensions = array<i32: 1>} : vector<2x16xi32>
    %c3_i32_8 = arith.constant 3 : i32
    %22 = vector.broadcast %c3_i32_8 : i32 to vector<2x16xi32>
    %23 = arith.shrsi %21, %22 : vector<2x16xi32>
    %24 = tpu.iota {dimensions = array<i32: 0>} : vector<2x16xi32>
    %25 = arith.cmpi eq, %23, %24 : vector<2x16xi32>
    %26 = arith.extui %25 : vector<2x16xi1> to vector<2x16xi32>
    %27 = arith.sitofp %26 : vector<2x16xi32> to vector<2x16xf32>
    %cst_9 = arith.constant dense<0.000000e+00> : vector<2x32xf32>
    %28 = tpu.matmul %27, %13, %cst_9 {dimension_numbers = #tpu.dot_dimension_numbers<[1], [0], [0], [1], [0, 0, 1, 1], [], []>} : vector<2x16xf32>, vector<16x32xf32>, vector<2x32xf32> -> vector<2x32xf32>
    %cst_10 = arith.constant 1.250000e-01 : f32
    %29 = vector.broadcast %cst_10 : f32 to vector<2x32xf32>
    %30 = arith.mulf %28, %29 : vector<2x32xf32>
    %c0_11 = arith.constant 0 : index
    %c0_12 = arith.constant 0 : index
    %31 = vector.load %arg2[%c0_11, %c0_12] : memref<32x16xf32, #tpu.memory_space<vmem>>, vector<32x16xf32>
    %cst_13 = arith.constant dense<0.000000e+00> : vector<2x16xf32>
    %32 = tpu.matmul %30, %31, %cst_13 {dimension_numbers = #tpu.dot_dimension_numbers<[1], [0], [0], [1], [0, 0, 1, 1], [], []>} : vector<2x32xf32>, vector<32x16xf32>, vector<2x16xf32> -> vector<2x16xf32>
    %33 = vector.broadcast %2 : vector<1x16xf32> to vector<2x16xf32>
    %34 = arith.addf %32, %33 : vector<2x16xf32>
    %35 = vector.extract_strided_slice %34 {offsets = [0, 0], sizes = [2, 8], strides = [1, 1]} : vector<2x16xf32> to vector<2x8xf32>
    %36 = vector.extract_strided_slice %34 {offsets = [0, 8], sizes = [2, 8], strides = [1, 1]} : vector<2x16xf32> to vector<2x8xf32>
    %cst_14 = arith.constant 5.000000e-01 : f32
    %37 = vector.broadcast %cst_14 : f32 to vector<2x8xf32>
    %38 = arith.mulf %37, %36 : vector<2x8xf32>
    %39 = math.exp %38 : vector<2x8xf32>
    %40 = arith.mulf %5, %39 : vector<2x8xf32>
    %41 = arith.addf %40, %35 : vector<2x8xf32>
    %c0_15 = arith.constant 0 : index
    %c0_16 = arith.constant 0 : index
    %42 = vector.load %arg4[%c0_15, %c0_16] : memref<10x32xf32, #tpu.memory_space<vmem>>, vector<8x32xf32>
    %cst_17 = arith.constant dense<0.000000e+00> : vector<2x32xf32>
    %43 = tpu.matmul %41, %42, %cst_17 {dimension_numbers = #tpu.dot_dimension_numbers<[1], [0], [0], [1], [0, 0, 1, 1], [], []>} : vector<2x8xf32>, vector<8x32xf32>, vector<2x32xf32> -> vector<2x32xf32>
    %c8 = arith.constant 8 : index
    %c0_18 = arith.constant 0 : index
    %44 = vector.load %arg4[%c8, %c0_18] : memref<10x32xf32, #tpu.memory_space<vmem>>, vector<2x32xf32>
    %cst_19 = arith.constant dense<0.000000e+00> : vector<2x32xf32>
    %45 = tpu.matmul %6, %44, %cst_19 {dimension_numbers = #tpu.dot_dimension_numbers<[1], [0], [0], [1], [0, 0, 1, 1], [], []>} : vector<2x2xf32>, vector<2x32xf32>, vector<2x32xf32> -> vector<2x32xf32>
    %46 = arith.addf %43, %45 : vector<2x32xf32>
    %c0_20 = arith.constant 0 : index
    %c0_21 = arith.constant 0 : index
    %47 = vector.load %arg3[%c0_20, %c0_21] : memref<32x32xf32, #tpu.memory_space<vmem>>, vector<32x32xf32>
    %cst_22 = arith.constant dense<0.000000e+00> : vector<16x32xf32>
    %48 = tpu.matmul %13, %47, %cst_22 {dimension_numbers = #tpu.dot_dimension_numbers<[1], [0], [0], [1], [0, 0, 1, 1], [], []>} : vector<16x32xf32>, vector<32x32xf32>, vector<16x32xf32> -> vector<16x32xf32>
    %cst_23 = arith.constant dense<0.000000e+00> : vector<16x32xf32>
    %49 = tpu.matmul %20, %46, %cst_23 {dimension_numbers = #tpu.dot_dimension_numbers<[1], [0], [0], [1], [0, 0, 1, 1], [], []>} : vector<16x2xf32>, vector<2x32xf32>, vector<16x32xf32> -> vector<16x32xf32>
    %50 = arith.addf %48, %49 : vector<16x32xf32>
    %51 = vector.broadcast %3 : vector<1x32xf32> to vector<16x32xf32>
    %52 = arith.addf %50, %51 : vector<16x32xf32>
    %53 = math.tanh %52 : vector<16x32xf32>
    %c0_24 = arith.constant 0 : index
    %c0_25 = arith.constant 0 : index
    %54 = vector.load %arg5[%c0_24, %c0_25] : memref<32x16xf32, #tpu.memory_space<vmem>>, vector<32x16xf32>
    %cst_26 = arith.constant dense<0.000000e+00> : vector<16x16xf32>
    %55 = tpu.matmul %53, %54, %cst_26 {dimension_numbers = #tpu.dot_dimension_numbers<[1], [0], [0], [1], [0, 0, 1, 1], [], []>} : vector<16x32xf32>, vector<32x16xf32>, vector<16x16xf32> -> vector<16x16xf32>
    %56 = vector.broadcast %4 : vector<1x16xf32> to vector<16x16xf32>
    %57 = arith.addf %55, %56 : vector<16x16xf32>
    %cst_27 = arith.constant dense<0xFF800000> : vector<16xf32>
    %58 = vector.multi_reduction <maximumf>, %57, %cst_27 [1] : vector<16x16xf32> to vector<16xf32>
    %59 = vector.shape_cast %58 : vector<16xf32> to vector<16x1xf32>
    %60 = vector.broadcast %59 : vector<16x1xf32> to vector<16x16xf32>
    %61 = arith.subf %57, %60 : vector<16x16xf32>
    %62 = math.exp %61 : vector<16x16xf32>
    %cst_28 = arith.constant dense<0.000000e+00> : vector<16xf32>
    %63 = vector.multi_reduction <add>, %62, %cst_28 [1] : vector<16x16xf32> to vector<16xf32>
    %64 = vector.shape_cast %63 : vector<16xf32> to vector<16x1xf32>
    %65 = math.log %64 : vector<16x1xf32>
    %66 = arith.addf %65, %59 : vector<16x1xf32>
    %67 = vector.broadcast %66 : vector<16x1xf32> to vector<16x16xf32>
    %68 = arith.subf %57, %67 : vector<16x16xf32>
    %cst_29 = arith.constant 0.000000e+00 : f32
    %69 = vector.broadcast %cst_29 : f32 to vector<16x128xf32>
    %c0_30 = arith.constant 0 : index
    %c0_31 = arith.constant 0 : index
    %70 = vector.load %arg6[%c0_30, %c0_31] : memref<16x128xf32, #tpu.memory_space<vmem>>, vector<16x128xf32>
    tpu.vector_store %arg6[%c0_30, %c0_31], %69 {strides = array<i32>} : memref<16x128xf32, #tpu.memory_space<vmem>>, vector<16x128xf32>,
    %c0_32 = arith.constant 0 : index
    %c0_33 = arith.constant 0 : index
    %71 = vector.load %arg6[%c0_32, %c0_33] : memref<16x128xf32, #tpu.memory_space<vmem>>, vector<16x16xf32>
    tpu.vector_store %arg6[%c0_32, %c0_33], %68 {strides = array<i32>} : memref<16x128xf32, #tpu.memory_space<vmem>>, vector<16x16xf32>,
    %c0_34 = arith.constant 0 : index
    %c64 = arith.constant 64 : index
    %72 = vector.load %arg6[%c0_34, %c64] : memref<16x128xf32, #tpu.memory_space<vmem>>, vector<2x16xf32>
    tpu.vector_store %arg6[%c0_34, %c64], %34 {strides = array<i32>} : memref<16x128xf32, #tpu.memory_space<vmem>>, vector<2x16xf32>,
    %c0_35 = arith.constant 0 : index
    %c80 = arith.constant 80 : index
    %73 = vector.load %arg6[%c0_35, %c80] : memref<16x128xf32, #tpu.memory_space<vmem>>, vector<2x8xf32>
    tpu.vector_store %arg6[%c0_35, %c80], %41 {strides = array<i32>} : memref<16x128xf32, #tpu.memory_space<vmem>>, vector<2x8xf32>,
    %c0_36 = arith.constant 0 : index
    %c88 = arith.constant 88 : index
    %74 = vector.load %arg6[%c0_36, %c88] : memref<16x128xf32, #tpu.memory_space<vmem>>, vector<2x2xf32>
    tpu.vector_store %arg6[%c0_36, %c88], %6 {strides = array<i32>} : memref<16x128xf32, #tpu.memory_space<vmem>>, vector<2x2xf32>,
    return
  }
}

</mosaic_0001>

<bundles_post_ra>
// kernel: wsvae_forward.1
= control target key start
LH: loop header
LB: loop body
LE: loop exit
PB: predicated region body
PF: predicated region fallthrough
CT: control target
= control target key end

     0   :  { %v921_v0 = vmov 0   ;;  %v922_v6 = vmov 0.0   ;;  %v32_v10 = vlaneseq  ;;  %vm48_vm0 = vcmask 130048   ;;  %s924_s21 = smov 120   ;;  %s926_s14 = smov 88   ;;  %s1121_s0 = inlined_call_operand.vmem [shape: f32[24,128], index: 0, kind: input, shape index: {}]   ;;  %s1122_s1 = inlined_call_operand.vmem [shape: f32[16,32], index: 1, kind: input, shape index: {}]   ;;  %s1123_s2 = inlined_call_operand.vmem [shape: f32[32,16], index: 2, kind: input, shape index: {}]   ;;  %s1124_s4 = inlined_call_operand.vmem [shape: f32[10,32], index: 4, kind: input, shape index: {}]   ;;  %s1125_s3 = inlined_call_operand.vmem [shape: f32[32,32], index: 3, kind: input, shape index: {}]   ;;  %s1126_s5 = inlined_call_operand.vmem [shape: f32[32,16], index: 5, kind: input, shape index: {}]   ;;  %s1127_s6 = inlined_call_operand.vmem [shape: f32[16,128], index: 6, kind: output, shape index: {}]  }
   0x1   :  { %906 = vset.pattern.permute.xlu0 %v921_v0  ;;  %v23_v1 = vld [vmem:[%s1121_s0] sm:$0xff]  ;;  %v24_v2 = vld [vmem:[%s1121_s0 + $0x8] sm:$0xff]  ;;  %840 = vmatprep.subr.mxu1 %v922_v6  ;;  %vm923_vm3 = vmmov 0   ;;  %v222_v16 = vld [vmem:[%s1123_s2 + $0x18] sm:$0xff]  ;;  %vm227_vm5 = vcmask 261120   ;;  %vm316_vm6 = vcmask 1041408   ;;  %756 = vst [vmem:[%s1127_s6] sm:$0xff] %v922_v6 }
   0x2   :  { %v895_v3 = vtrunc.f32 %v23_v1  ;;  %v897_v4 = vtrunc.f32 %v24_v2  ;;  %v47_v5 = vld [vmem:[%s1122_s1 + $0x8] sm:$0xff]  ;;  %v46_v8 = vld [vmem:[%s1122_s1] sm:$0xff]  ;;  %v977_v11 = vand.u32 127, %v32_v10  ;;  %844 = vmatprep.mubr.msk.f32.mxu1 %vm923_vm3, %v922_v6  ;;  %v221_v17 = vld [vmem:[%s1123_s2 + $0x10] sm:$0xff]  ;;  %v997_v18 = vshrl.u32 %v32_v10, 7  ;;  %s927_s15 = smov 64  }
   0x3   :  { %833 = vmatprep.subr.mxu0 %v47_v5  ;;  %v220_v23 = vld [vmem:[%s1123_s2 + $0x8] sm:$0xff]  ;;  %v219_v24 = vld [vmem:[%s1123_s2] sm:$0xff]  ;;  %v1018_v28 = vld [vmem:[%s1121_s0 + $0x15] sm:$0x3]  ;;  %vm312_vm7 = vcmask 15360   ;;  %vm390_vm8 = vcmask 64512  }
   0x4   :  { %v896_v7 = vcvt.f32.s32 %v895_v3  ;;  %834 = vmatpush3.msra.mxu0 %v47_v5  ;;  %v898_v9 = vcvt.f32.s32 %v897_v4  ;;  %v141_v19 = vshra.s32 %v977_v11, 3  ;;  %v311_v29 = vld [vmem:[%s1124_s4 + $0x8] sm:$0x3]  ;;  %v788_v30 = vld [vmem:[%s1121_s0 + $0x10] ss:$0 sm:$0xff]  ;;  %v310_v36 = vld [vmem:[%s1124_s4] sm:$0xff] }
   0x5   :  { %835 = vmatprep.subr.mxu0 %v46_v8  ;;  %v467_v37 = vld [vmem:[%s1125_s3 + $0x18] sm:$0xff]  ;;  %v30_v41 = vld [vmem:[%s1121_s0 + $0x13] sm:$0x3]  ;;  %v465_v46 = vld [vmem:[%s1125_s3 + $0x8] sm:$0xff]  ;;  %v133_v48 = vshra.s32 %v997_v18, 3  ;;  %v132_v50 = vadd.s32 8, %v997_v18 }
   0x6   :  { %35 = vperm.xlu0 %906, %v896_v7   ;;  %836 = vmatpush3.msra.mxu0 %v46_v8  ;;  %vm142_vm4 = vcmp.eq.s32.totalorder %v141_v19, %v997_v18  ;;  %v466_v45 = vld [vmem:[%s1125_s3 + $0x10] sm:$0xff]  ;;  %v464_v47 = vld [vmem:[%s1125_s3] sm:$0xff]  ;;  %v644_v56 = vld [vmem:[%s1126_s5 + $0x18] sm:$0xff]  ;;  %757 = vst [vmem:[%s1127_s6 + $0x8] sm:$0xff] %v922_v6  ;;  %vm764_vm11 = vcmask 648704   ;;  %vm769_vm12 = vcmask 714368  }
   0x7   :  { %847 = vmatprep.subr.mxu0 %v922_v6  ;;  %v786_v21 = vsel %vm142_vm4, 1.0, %v922_v6  ;;  %vm135_vm9 = vcmp.eq.s32.totalorder %v133_v48, %v977_v11  ;;  %v134_v51 = vshra.s32 %v132_v50, 3  ;;  %v643_v57 = vld [vmem:[%s1126_s5 + $0x10] sm:$0xff]  ;;  %v642_v58 = vld [vmem:[%s1126_s5 + $0x8] sm:$0xff]  ;;  %v641_v59 = vld [vmem:[%s1126_s5] sm:$0xff]  ;;  %vm774_vm13 = vcmask 730816  }
   0x8   :  { %v784_v49 = vsel %vm135_vm9, 1.0, %v922_v6  ;;  %v798_v62 = vld [vmem:[%s1121_s0 + $0x11] ss:$0 sm:$0xff]  ;;  %v799_v8 = vld [vmem:[%s1121_s0 + $0x12] ss:$0 sm:$0xff]  ;;  %s925_s0 = smov 80  }
   0x9   :  { %vm136_vm10 = vcmp.eq.s32.totalorder %v134_v51, %v977_v11 }
   0xa   :  { %38 = vperm.xlu0 %906, %v898_v9   ;;  %v785_v55 = vsel %vm136_vm10, 1.0, %v922_v6 }
  0x81   :  { %v36_v12 = vpop.permute.xlu0 %35 }
  0x82   :  { %vm40_vm1 = vcmp.eq.s32.totalorder %v36_v12, %v977_v11 }
  0x83   :  { %v780_v13 = vsel %vm40_vm1, 1.0, %v922_v6 }
  0x84   :  { %837 = vmatprep.mubr.msk.f32.mxu0 %vm48_vm0, %v780_v13 }
  0x85   :  { %v39_v14 = vpop.permute.xlu0 %38 }
  0x86   :  { %vm41_vm2 = vcmp.eq.s32.totalorder %v39_v14, %v977_v11 }
  0x87   :  { %v781_v15 = vsel %vm41_vm2, 1.0, %v922_v6 }
  0x88   :  { %838 = vmatmul.mubr.msk.f32.vlgmr.msra.gmra.mxu0 %vm48_vm0, %v781_v15 }
  0x89   :  { %855 = vmatprep.mubr.msk.f32.mxu0 %vm923_vm3, %v922_v6  ;;  %848 = vmatpush3.msra.mxu0 %v222_v16 }
  0x8a   :  { %849 = vmatprep.subr.mxu0 %v922_v6 }
  0x8b   :  { %850 = vmatpush3.msra.mxu0 %v221_v17 }
  0x8c   :  { %851 = vmatprep.subr.mxu0 %v922_v6 }
  0x8d   :  { %852 = vmatpush3.msra.mxu0 %v220_v23 }
  0x8e   :  { %853 = vmatprep.subr.mxu0 %v922_v6 }
  0x8f   :  { %854 = vmatpush3.msra.mxu0 %v219_v24 }
 0x148   :  { %v839_v20 = vpop.f32.mrf.mxu0 }
 0x149   :  { %841 = vmatpush3.msra.mxu1 %v839_v20 }
 0x14a   :  { %v121_v22 = vpop.f32.mrf.mxu0  ;;  %842 = vmatprep.subr.mxu1 %v922_v6 }
 0x14b   :  { %843 = vmatpush3.msra.mxu1 %v121_v22 }
 0x14c   :  { %845 = vmatmul.mubr.msk.f32.vlgmr.msra.gmra.mxu1 %vm48_vm0, %v786_v21  ;;  %858 = vmatprep.subr.mxu1 %v922_v6 }
 0x14d   :  { %860 = vmatprep.mubr.msk.f32.mxu1 %vm923_vm3, %v922_v6  ;;  %859 = vmatpush3.msk.msra.mxu1 %vm316_vm6, %v311_v29 }
 0x14e   :  { %863 = vmatprep.subr.mxu1 %v922_v6 }
 0x150   :  { %861 = vmatmul.mubr.msk.f32.vlgmr.msra.gmra.mxu1 %vm312_vm7, %v1018_v28 }
 0x151   :  { %865 = vmatprep.mubr.msk.f32.mxu1 %vm923_vm3, %v922_v6  ;;  %864 = vmatpush3.msra.mxu1 %v310_v36 }
 0x152   :  { %873 = vmatprep.subr.mxu1 %v467_v37 }
 0x20c   :  { %v214_v25 = vpop.f32.mrf.mxu1 }
 0x20d   :  { %v218_v26 = vmul.f32 0.125, %v214_v25 }
 0x20e   :  { %v846_v27 = vpop.f32.mrf.mxu1 }
 0x20f   :  { %856 = vmatmul.mubr.msk.f32.vlgmr.msra.gmra.mxu0 %vm227_vm5, %v218_v26 }
 0x210   :  { %v386_v39 = vpop.f32.mrf.mxu1  ;;  %870 = vmatprep.mubr.msk.f32.mxu0 %vm312_vm7, %v784_v49 }
 0x212   :  { %v862_v40 = vpop.f32.mrf.mxu1 }
 0x2cf   :  { %v297_v31 = vpop.f32.mrf.mxu0 }
 0x2d0   :  { %v1032_v32 = vadd.f32 %v788_v30, %v297_v31 }
 0x2d1   :  { %v857_v33 = vpop.f32.mrf.mxu0 }
 0x2d2   :  { %v301_v34 = vmul.f32 0.5, %v1032_v32 }
 0x2d4   :  { %v302_v35 = vmul.f32 1.442695, %v301_v34 }
 0x2d6   :  { %907 = vpow2.f32 %v302_v35 }
 0x2e3   :  { %v908_v38 = vpop.eup %907 }
 0x2e4   :  { %305 = vrot.lane.b32.xlu1 %v908_v38, %s924_s21 }
 0x356   :  { %v306_v42 = vpop.permute.xlu1 %305 }
 0x357   :  { %v308_v43 = vmul.f32 %v306_v42, %v30_v41 }
 0x359   :  { %v1045_v44 = vadd.f32 %v308_v43, %v1032_v32 }
 0x35b   :  { %866 = vmatmul.mubr.msk.f32.vlgmr.msra.gmra.mxu1 %vm390_vm8, %v1045_v44 }
 0x35c   :  { %874 = vmatpush3.msra.mxu1 %v467_v37  ;;  %881 = vmatprep.mubr.msk.f32.mxu1 %vm227_vm5, %v121_v22 }
 0x35d   :  { %875 = vmatprep.subr.mxu1 %v466_v45 }
 0x35e   :  { %876 = vmatpush3.msra.mxu1 %v466_v45 }
 0x35f   :  { %877 = vmatprep.subr.mxu1 %v465_v46 }
 0x360   :  { %878 = vmatpush3.msra.mxu1 %v465_v46 }
 0x361   :  { %879 = vmatprep.subr.mxu1 %v464_v47 }
 0x362   :  { %880 = vmatpush3.msra.mxu1 %v464_v47 }
 0x363   :  { %882 = vmatmul.mubr.msk.f32.vlgmr.msra.gmra.mxu1 %vm227_vm5, %v839_v20 }
 0x41b   :  { %v460_v52 = vpop.f32.mrf.mxu1 }
 0x41c   :  { %v461_v53 = vadd.f32 %v460_v52, %v386_v39 }
 0x41d   :  { %v867_v54 = vpop.f32.mrf.mxu1 }
 0x41e   :  { %868 = vmatprep.subr.msk.mxu0 %vm316_vm6, %v461_v53 }
 0x41f   :  { %869 = vmatpush3.msk.msra.mxu0 %vm316_vm6, %v461_v53 }
 0x420   :  { %871 = vmatmul.mubr.msk.f32.vlgmr.msra.gmra.mxu0 %vm312_vm7, %v785_v55  ;;  %884 = vmatprep.subr.mxu0 %v644_v56 }
 0x421   :  { %885 = vmatpush3.msra.mxu0 %v644_v56 }
 0x422   :  { %886 = vmatprep.subr.mxu0 %v643_v57 }
 0x423   :  { %887 = vmatpush3.msra.mxu0 %v643_v57  ;;  %v883_v60 = vpop.f32.mrf.mxu1 }
 0x424   :  { %888 = vmatprep.subr.mxu0 %v642_v58 }
 0x425   :  { %889 = vmatpush3.msra.mxu0 %v642_v58  ;;  %v624_v0 = vpop.f32.mrf.mxu1 }
 0x426   :  { %890 = vmatprep.subr.mxu0 %v641_v59 }
 0x427   :  { %891 = vmatpush3.msra.mxu0 %v641_v59 }
 0x4e0   :  { %v872_v61 = vpop.f32.mrf.mxu0 }
 0x4e1   :  { %v630_v63 = vadd.f32 %v883_v60, %v872_v61 }
 0x4e2   :  { %v543_v1 = vpop.f32.mrf.mxu0 }
 0x4e3   :  { %v625_v2 = vadd.f32 %v624_v0, %v543_v1  ;;  %v638_v3 = vadd.f32 %v798_v62, %v630_v63 }
 0x4e5   :  { %v637_v4 = vadd.f32 %v798_v62, %v625_v2 }
 0x4e7   :  { %909 = vtanh.f32 %v637_v4 }
 0x4e8   :  { %911 = vtanh.f32 %v638_v3 }
 0x4f4   :  { %v910_v5 = vpop.eup %909 }
 0x4f5   :  { %v912_v7 = vpop.eup %911  ;;  %892 = vmatprep.mubr.msk.f32.mxu0 %vm227_vm5, %v910_v5 }
 0x4f6   :  { %893 = vmatmul.mubr.msk.f32.vlgmr.msra.gmra.mxu0 %vm227_vm5, %v912_v7 }
 0x5b6   :  { %v894_v9 = vpop.f32.mrf.mxu0 }
 0x5b7   :  { %v727_v10 = vadd.f32 %v894_v9, %v799_v8 }
 0x5b8   :  { %v721_v11 = vpop.f32.mrf.mxu0 }
 0x5b9   :  { %v722_v12 = vadd.f32 %v799_v8, %v721_v11  ;;  %v733_v13 = vsel %vm48_vm0, %v727_v10, -inf }
 0x5ba   :  { %734 = vmax.xlane.f32.xlu0 %v733_v13 }
 0x5bb   :  { %v730_v14 = vsel %vm48_vm0, %v722_v12, -inf }
 0x5bc   :  { %731 = vmax.xlane.f32.xlu1 %v730_v14 }
 0x643   :  { %v735_v15 = vpop.xlane.xlu0 %734 }
 0x644   :  { %v737_v16 = vsub.f32 %v727_v10, %v735_v15 }
 0x645   :  { %v732_v17 = vpop.xlane.xlu1 %731 }
 0x646   :  { %v740_v18 = vmul.f32 1.442695, %v737_v16  ;;  %v736_v19 = vsub.f32 %v722_v12, %v732_v17 }
 0x648   :  { %913 = vpow2.f32 %v740_v18  ;;  %v738_v20 = vmul.f32 1.442695, %v736_v19 }
 0x64a   :  { %915 = vpow2.f32 %v738_v20 }
 0x655   :  { %v914_v21 = vpop.eup %913 }
 0x656   :  { %v745_v22 = vsel %vm48_vm0, %v914_v21, 0.0 }
 0x657   :  { %v916_v23 = vpop.eup %915  ;;  %746 = vadd.xlane.f32.xlu1 %v745_v22 }
 0x658   :  { %v742_v24 = vsel %vm48_vm0, %v916_v23, 0.0 }
 0x659   :  { %743 = vadd.xlane.f32.xlu0 %v742_v24 }
 0x668   :  { %766 = vrot.lane.b32.xlu1 %v1045_v44, %s925_s0 }
 0x66c   :  { %771 = vrot.lane.b32.xlu1 %v1018_v28, %s926_s14 }
 0x66f   :  { %761 = vrot.lane.b32.xlu0 %v1032_v32, %s927_s15 }
 0x6e0   :  { %v747_v25 = vpop.xlane.xlu1 %746 }
 0x6e1   :  { %917 = vlog2.f32 %v747_v25 }
 0x6e2   :  { %v744_v26 = vpop.xlane.xlu0 %743 }
 0x6e3   :  { %919 = vlog2.f32 %v744_v26 }
 0x6e4   :  { %v767_v34 = vpop.permute.xlu1 %766 }
 0x6e6   :  { %v762_v6 = vpop.permute.xlu0 %761 }
 0x6e8   :  { %v772_v36 = vpop.permute.xlu1 %771 }
 0x6ee   :  { %v918_v27 = vpop.eup %917 }
 0x6ef   :  { %v751_v29 = vmul.f32 0.6931472, %v918_v27 }
 0x6f0   :  { %v920_v28 = vpop.eup %919 }
 0x6f1   :  { %v753_v30 = vadd.f32 %v751_v29, %v735_v15  ;;  %v749_v31 = vmul.f32 0.6931472, %v920_v28 }
 0x6f3   :  { %v755_v32 = vsub.f32 %v727_v10, %v753_v30  ;;  %v752_v33 = vadd.f32 %v749_v31, %v732_v17 }
 0x6f5   :  { %v754_v35 = vsub.f32 %v722_v12, %v752_v33  ;;  %759 = vst.msk [vmem:[%s1127_s6 + $0x8] sm:$0xff] %vm48_vm0, %v755_v32 }
 0x6f7   :  { %758 = vst.msk [vmem:[%s1127_s6] sm:$0xff] %vm48_vm0, %v754_v35 }
 0x6f8   :  { %765 = vst.msk [vmem:[%s1127_s6] sm:$0x3] %vm764_vm11, %v762_v6 }
 0x6f9   :  { %770 = vst.msk [vmem:[%s1127_s6] sm:$0x3] %vm769_vm12, %v767_v34 }
 0x6fa   :  { %775 = vst.msk [vmem:[%s1127_s6] sm:$0x3] %vm774_vm13, %v772_v36 }

</bundles_post_ra>
